<compile_context>
chip_gen: v5e
topology: v5e:2x2
jax: 0.10.0
libtpu: 0.0.40
codegen_flags: <defaults>
</compile_context>

<pallas_src>
import functools

import jax
import jax.numpy as jnp
from jax.experimental import pallas as pl
from jax.experimental.pallas import tpu as pltpu


def _iwls_kernel(x_ref, w_ref, b_ref, o_ref):
    # x_ref: (nb, Cin, tile)   lane-dense spatial tile, nb batch entries per step
    # w_ref: (4*Cout, Cin)     fused (butterfly + exp(-scaling) + 0.5) weights, resident
    # b_ref: (4*Cout, 1)       fused bias (broadcast over lanes), f32
    # o_ref: (nb, 4*Cout, tile)
    w = w_ref[...]
    bias = b_ref[...]
    nb = x_ref.shape[0]
    for i in range(nb):                      # small static unroll; nb <= 32
        y = jnp.dot(w, x_ref[i], preferred_element_type=jnp.float32)
        o_ref[i] = (y + bias).astype(o_ref.dtype)


def _fold_params(w, b, scaling_factors):
    """Fold exp(-scaling), the 0.5 Haar synthesis gain and the [LL,LH,HL,HH] -> (di,dj)
    butterfly into the linear layer.  Returned rows are ordered (cout, di, dj)."""
    four_cout, cin = w.shape
    cout = four_cout // 4
    inv_s = jnp.exp(-scaling_factors.astype(jnp.float32)).reshape(four_cout)
    wk = (inv_s[:, None] * w.astype(jnp.float32)).reshape(4, cout, cin)   # k over [LL,LH,HL,HH]
    bk = (inv_s * b.astype(jnp.float32)).reshape(4, cout)
    # Sign table: rows = output subpixel g = di*2 + dj, cols = wavelet group k.
    s = jnp.array([[1.,  1.,  1.,  1.],    # (di=0, dj=0)
                   [1.,  1., -1., -1.],    # (di=0, dj=1)
                   [1., -1.,  1., -1.],    # (di=1, dj=0)
                   [1., -1., -1.,  1.]],   # (di=1, dj=1)
                  jnp.float32)
    w_fused = 0.5 * jnp.einsum("gk,kci->cgi", s, wk).reshape(four_cout, cin)
    b_fused = 0.5 * jnp.einsum("gk,kc->cg", s, bk).reshape(four_cout, 1)
    return w_fused, b_fused


def _plan_tiles(batch, hw, lane_bytes, *, target_lanes=16384,
                vmem_budget_bytes=24 << 20, max_batch_block=32):
    """Pick (spatial tile, batch block, spatial grid).

    lane_bytes = double-buffered VMEM bytes per (batch entry, spatial lane).
    Tile is a multiple of 128 whenever hw >= 128 (unmasked lane-dense stores); a ragged last
    tile (cdiv grid) covers non-128-divisible hw.  Batch blocking amortizes per-step overhead
    for small images; the grid is kept >= 2 steps so both v7x TensorCores get work.
    """
    cap = max(128, min(target_lanes, vmem_budget_bytes // max(lane_bytes, 1)))
    cap = (cap // 128) * 128
    if hw < 128:
        tile = hw                                   # full extent (legal block)
    else:
        tile = min(cap, (hw // 128) * 128)
    grid_s = pl.cdiv(hw, tile)
    nb = max(1, min(batch, max_batch_block, cap // tile))
    if pl.cdiv(batch, nb) * grid_s < 2:             # keep both v7x TCs busy
        if batch >= 2:
            nb = pl.cdiv(batch, 2)
        elif grid_s == 1 and tile >= 256:
            tile = max(128, ((tile // 2 + 127) // 128) * 128)
            grid_s = pl.cdiv(hw, tile)
    return tile, nb, grid_s


@functools.partial(jax.jit, static_argnames=("blocked_output", "out_dtype", "target_lanes"))
def iwls_forward(x, w, b, scaling_factors, *, blocked_output=False,
                 out_dtype=jnp.float32, target_lanes=16384):
    """x: (B, Cin, H, W).  w: (4*Cout, Cin).  b: (4*Cout,).  scaling_factors: (4*Cout,).
    Returns (B, Cout, 2H, 2W), or the subpixel-blocked (B, Cout, 2, 2, H, W) view when
    blocked_output=True (skips the final XLA interleave pass)."""
    B, Cin, H, W = x.shape
    four_cout = w.shape[0]
    cout = four_cout // 4
    HW = H * W

    x_flat = x.reshape(B, Cin, HW)                  # free: no transpose over x
    w_fused, b_fused = _fold_params(w, b, scaling_factors)
    if x.dtype == jnp.bfloat16:
        # Halve the x/w read traffic and hit the native MXU rate; accumulation stays f32.
        w_fused = w_fused.astype(jnp.bfloat16)

    x_bytes = jnp.dtype(x.dtype).itemsize
    o_bytes = jnp.dtype(out_dtype).itemsize
    lane_bytes = 2 * (Cin * x_bytes + four_cout * o_bytes)   # double-buffered x + out per lane
    tile, nb, grid_s = _plan_tiles(B, HW, lane_bytes, target_lanes=target_lanes)
    grid = (pl.cdiv(B, nb), grid_s)

    x_blk = nb * Cin * tile * x_bytes
    o_blk = nb * four_cout * tile * o_bytes
    param_bytes = (four_cout * Cin + four_cout) * 4 * 2
    vmem_limit = int(min(max(2 * (x_blk + o_blk) + param_bytes + (4 << 20), 16 << 20),
                         56 << 20))                 # stays under v7x's 64 MiB physical VMEM

    y = pl.pallas_call(
        _iwls_kernel,
        out_shape=jax.ShapeDtypeStruct((B, four_cout, HW), out_dtype),
        grid_spec=pltpu.PrefetchScalarGridSpec(
            num_scalar_prefetch=0,
            grid=grid,
            in_specs=[
                pl.BlockSpec((nb, Cin, tile), lambda bi, si: (bi, 0, si)),
                pl.BlockSpec((four_cout, Cin), lambda bi, si: (0, 0)),
                pl.BlockSpec((four_cout, 1), lambda bi, si: (0, 0)),
            ],
            out_specs=pl.BlockSpec((nb, four_cout, tile), lambda bi, si: (bi, 0, si)),
        ),
        compiler_params=pltpu.CompilerParams(
            dimension_semantics=("parallel", "parallel"),
            vmem_limit_bytes=vmem_limit),
    )(x_flat, w_fused, b_fused)

    # Fused-row order (cout, di, dj) makes this a pure row-major view (zero-copy).
    blocked = y.reshape(B, cout, 2, 2, H, W)        # [b, c, di, dj, h, w]
    if blocked_output:
        return blocked
    # TODO(synk): this (di, dj) subpixel interleave is the one remaining XLA HBM pass; use
    # blocked_output=True for consumers that can read the blocked layout.
    return jnp.transpose(blocked, (0, 1, 4, 2, 5, 3)).reshape(B, cout, 2 * H, 2 * W)


def iwls_reference(x, w, b, scaling_factors):
    """Pure-JAX reference mirroring the PyTorch forward."""
    B, Cin, H, W = x.shape
    cout = w.shape[0] // 4
    xf = jnp.transpose(x.reshape(B, Cin, H * W), (0, 2, 1))          # (B, HW, Cin)
    y = xf @ w.T + b                                                  # (B, HW, 4*Cout)
    y = y / jnp.exp(scaling_factors)
    y = jnp.transpose(y.reshape(B, H, W, 4 * cout), (0, 3, 1, 2))     # (B, 4*Cout, H, W)
    ll, lh, hl, hh = jnp.split(y, 4, axis=1)
    out = jnp.zeros((B, cout, 2 * H, 2 * W), jnp.float32)
    out = out.at[:, :, 0::2, 0::2].set(0.5 * (ll + lh + hl + hh))
    out = out.at[:, :, 0::2, 1::2].set(0.5 * (ll + lh - hl - hh))
    out = out.at[:, :, 1::2, 0::2].set(0.5 * (ll - lh + hl - hh))
    out = out.at[:, :, 1::2, 1::2].set(0.5 * (ll - lh - hl + hh))
    return out


if __name__ == "__main__":
    key = jax.random.PRNGKey(0)
    B, Cin, H, W = 2, 16, 16, 16        # in_dim = Cin
    out_dim = 8                          # OLP maps Cin -> 4*out_dim

    k1, k2, k3, k4 = jax.random.split(key, 4)
    x = jax.random.normal(k1, (B, Cin, H, W), jnp.float32)

    # Deterministic parameter init (nn.Linear-style uniform bounds).
    bound = 1.0 / (Cin ** 0.5)
    w = jax.random.uniform(k2, (4 * out_dim, Cin), jnp.float32, -bound, bound)
    b = jax.random.uniform(k3, (4 * out_dim,), jnp.float32, -bound, bound)

    # scaling_factors: cat([0.5*ones, 0.5*ones, 0.5*ones, zeros]) along channel dim.
    scaling = jnp.concatenate([
        jnp.full((out_dim,), 0.5, jnp.float32),
        jnp.full((out_dim,), 0.5, jnp.float32),
        jnp.full((out_dim,), 0.5, jnp.float32),
        jnp.zeros((out_dim,), jnp.float32),
    ])

    out = jax.block_until_ready(iwls_forward(x, w, b, scaling))
    ref = jax.block_until_ready(iwls_reference(x, w, b, scaling))
    assert out.shape == (B, out_dim, 2 * H, 2 * W), out.shape
    assert bool(jnp.allclose(out, ref, rtol=1e-3, atol=1e-3)), "mismatch vs reference"

    # Blocked-layout path (skips the final XLA interleave entirely).
    blocked = jax.block_until_ready(iwls_forward(x, w, b, scaling, blocked_output=True))
    assert blocked.shape == (B, out_dim, 2, 2, H, W), blocked.shape
    assert bool(jnp.allclose(blocked[:, :, 1, 0], ref[:, :, 1::2, 0::2],
                             rtol=1e-3, atol=1e-3)), "blocked layout mismatch"

    # Unaligned spatial extent (H*W = 240 not a multiple of 128) exercises the cdiv grid
    # with a ragged last tile instead of the old full-HW fallback block.
    H2, W2 = 12, 20
    x2 = jax.random.normal(k4, (B, Cin, H2, W2), jnp.float32)
    out2 = jax.block_until_ready(iwls_forward(x2, w, b, scaling))
    ref2 = jax.block_until_ready(iwls_reference(x2, w, b, scaling))
    assert out2.shape == (B, out_dim, 2 * H2, 2 * W2), out2.shape
    assert bool(jnp.allclose(out2, ref2, rtol=1e-3, atol=1e-3)), "ragged-tile mismatch"

    print("KERNEL_OK")
</pallas_src>

<mosaic_0001>
module attributes {stable_mosaic.version = 11 : i64} {
  func.func @_iwls_kernel(%arg0: i32, %arg1: i32, %arg2: memref<1x16x256xf32, #tpu.memory_space<vmem>>, %arg3: memref<32x16xf32, #tpu.memory_space<vmem>>, %arg4: memref<32x1xf32, #tpu.memory_space<vmem>>, %arg5: memref<1x32x256xf32, #tpu.memory_space<vmem>>) attributes {dimension_semantics = [#tpu.dimension_semantics<parallel>, #tpu.dimension_semantics<parallel>], iteration_bounds = array<i64: 2, 1>, scalar_prefetch = 0 : i64, scratch_operands = 0 : i64, tpu.core_type = #tpu.core_type<tc>, window_params = [{transform_indices = @transform_0, window_bounds = array<i64: 1, 16, 256>}, {pipeline_mode = #tpu.pipeline_mode<synchronous>, transform_indices = @transform_1, window_bounds = array<i64: 32, 16>}, {pipeline_mode = #tpu.pipeline_mode<synchronous>, transform_indices = @transform_2, window_bounds = array<i64: 32, 1>}, {transform_indices = @transform_3, window_bounds = array<i64: 1, 32, 256>}]} {
    %c0 = arith.constant 0 : index
    %c0_0 = arith.constant 0 : index
    %0 = vector.load %arg3[%c0, %c0_0] : memref<32x16xf32, #tpu.memory_space<vmem>>, vector<32x16xf32>
    %c0_1 = arith.constant 0 : index
    %c0_2 = arith.constant 0 : index
    %1 = vector.load %arg4[%c0_1, %c0_2] : memref<32x1xf32, #tpu.memory_space<vmem>>, vector<32x1xf32>
    %c0_3 = arith.constant 0 : index
    %c0_4 = arith.constant 0 : index
    %c0_5 = arith.constant 0 : index
    %2 = vector.load %arg2[%c0_3, %c0_4, %c0_5] : memref<1x16x256xf32, #tpu.memory_space<vmem>>, vector<1x16x256xf32>
    %3 = vector.shape_cast %2 : vector<1x16x256xf32> to vector<16x256xf32>
    %cst = arith.constant dense<0.000000e+00> : vector<32x256xf32>
    %4 = tpu.matmul %0, %3, %cst {dimension_numbers = #tpu.dot_dimension_numbers<[1], [0], [0], [1], [0, 0, 1, 1], [], []>} : vector<32x16xf32>, vector<16x256xf32>, vector<32x256xf32> -> vector<32x256xf32>
    %5 = vector.broadcast %1 : vector<32x1xf32> to vector<32x256xf32>
    %6 = arith.addf %4, %5 : vector<32x256xf32>
    %c0_6 = arith.constant 0 : index
    %c0_7 = arith.constant 0 : index
    %c0_8 = arith.constant 0 : index
    %7 = vector.load %arg5[%c0_6, %c0_7, %c0_8] : memref<1x32x256xf32, #tpu.memory_space<vmem>>, vector<1x32x256xf32>
    %8 = vector.shape_cast %7 : vector<1x32x256xf32> to vector<32x256xf32>
    %9 = vector.shape_cast %6 : vector<32x256xf32> to vector<1x32x256xf32>
    tpu.vector_store %arg5[%c0_6, %c0_7, %c0_8], %9 {strides = array<i32>} : memref<1x32x256xf32, #tpu.memory_space<vmem>>, vector<1x32x256xf32>,
    return
  }
  func.func @transform_0(%arg0: i32, %arg1: i32) -> (i32, i32, i32) {
    %c0_i32 = arith.constant 0 : i32
    %c0_i32_0 = arith.constant 0 : i32
    return %arg0, %c0_i32, %arg1 : i32, i32, i32
  }
  func.func @transform_1(%arg0: i32, %arg1: i32) -> (i32, i32) {
    %c0_i32 = arith.constant 0 : i32
    %c0_i32_0 = arith.constant 0 : i32
    %c0_i32_1 = arith.constant 0 : i32
    return %c0_i32, %c0_i32_0 : i32, i32
  }
  func.func @transform_2(%arg0: i32, %arg1: i32) -> (i32, i32) {
    %c0_i32 = arith.constant 0 : i32
    %c0_i32_0 = arith.constant 0 : i32
    %c0_i32_1 = arith.constant 0 : i32
    return %c0_i32, %c0_i32_0 : i32, i32
  }
  func.func @transform_3(%arg0: i32, %arg1: i32) -> (i32, i32, i32) {
    %c0_i32 = arith.constant 0 : i32
    %c0_i32_0 = arith.constant 0 : i32
    return %arg0, %c0_i32, %arg1 : i32, i32, i32
  }
}

</mosaic_0001>

<bundles_post_ra>
// kernel: iwls_forward.1
= control target key start
LH: loop header
LB: loop body
LE: loop exit
PB: predicated region body
PF: predicated region fallthrough
CT: control target
= control target key end

     0   :  { %s505_s12 = smov 0   ;;  %s507_s13 = smov 0   ;;  %s574_s0 = inlined_call_operand.vmem [shape: f32[2,16,256], index: 0, kind: input, shape index: {}]   ;;  %s575_s1 = inlined_call_operand.vmem [shape: f32[32,16], index: 1, kind: input, shape index: {}]   ;;  %s576_s2 = inlined_call_operand.vmem [shape: f32[32,1], index: 2, kind: input, shape index: {}]   ;;  %s577_s3 = inlined_call_operand.vmem [shape: f32[2,32,256], index: 3, kind: output, shape index: {}]  }
   0x1   :  { %s509_s14 = smov 0  }
   0x2 LB: > { %s25_s15 = sadd.s32 1, %s478_s13  ;;  %p412_p0 = scmp.ge.s32.totalorder %s482_s14, 1  ;;  %s482_s14 = sphi %s509_s14, %s13_s14   ;;  %s478_s13 = sphi %s507_s13, %s579_s13   ;;  %s474_s12 = sphi %s505_s12, %s578_s12  }
   0x3   : > { %p27_p1 = scmp.ge.s32.totalorder %s25_s15, 2  ;;  %p158_p2 = scmp.lt.s32.totalorder %s482_s14, 3 }
   0x5   : > { %s581_s15 = smov (%p27_p1, %s25_s15), 0  ;;  %p159_p3 = pnand %p412_p0, %p158_p2 }
   0x6   : > { %p191_p4 = scmp.lt.s32.totalorder (!%p159_p3), %s474_s12, 1 }
   0x7   : > { %162 = sbr.rel (%p159_p3) target bundleno = 164 (0xa4), region = 32 }
   0xc   : > { %v484_v0 = vmov 0   ;;  %v216_v1 = vld [vmem:[%s576_s2 + $0x10] sm:$0xff]  ;;  %v214_v2 = vld [vmem:[%s576_s2] sm:$0xff]  ;;  %s583_s12 = smov (!%p191_p4, %s474_s12), 1  ;;  %vm242_vm0 = vcmask 130048   ;;  %v217_v9 = vld [vmem:[%s576_s2 + $0x18] sm:$0xff] }
   0xd   : > { %459 = vset.pattern.permute.xlu1 %v484_v0  ;;  %458 = vset.pattern.permute.xlu0 %v484_v0  ;;  %s427_s20 = sshll.u32 %s583_s12, 5  ;;  %v210_v7 = vld [vmem:[%s575_s1] sm:$0xff]  ;;  %v212_v8 = vld [vmem:[%s575_s1 + $0x10] sm:$0xff]  ;;  %v215_v10 = vld [vmem:[%s576_s2 + $0x8] sm:$0xff]  ;;  %s428_s9 = sshll.u32 %s583_s12, 6 }
   0xe   : > { %234 = vperm.xlu1 %459, %v216_v1   ;;  %224 = vperm.xlu0 %458, %v214_v2   ;;  %s198_s23 = scalar_lea.vmem %s574_s0, %s427_s20  ;;  %v211_v11 = vld [vmem:[%s575_s1 + $0x8] sm:$0xff]  ;;  %v213_v12 = vld [vmem:[%s575_s1 + $0x18] sm:$0xff]  ;;  %s208_s16 = scalar_lea.vmem %s577_s3, %s428_s9 }
   0xf   : > { %v220_v3 = vld [vmem:[%s198_s23 + $0x10] sm:$0xff]  ;;  %v221_v4 = vld [vmem:[%s198_s23 + $0x18] sm:$0xff]  ;;  %v218_v5 = vld [vmem:[%s198_s23] sm:$0xff] }
  0x10   : > { %269 = vmatpush.msra.mxu0 %v220_v3  ;;  %429 = vmatpush.msra.mxu2 %v220_v3  ;;  %v219_v6 = vld [vmem:[%s198_s23 + $0x8] sm:$0xff] }
  0x11   : > { %298 = vmatpush.msra.mxu1 %v221_v4  ;;  %431 = vmatpush.msra.mxu3 %v221_v4 }
  0x12   : > { %270 = vmatpush.msra.mxu0 %v218_v5  ;;  %430 = vmatpush.msra.mxu2 %v218_v5 }
  0x13   : > { %299 = vmatpush.msra.mxu1 %v219_v6  ;;  %432 = vmatpush.msra.mxu3 %v219_v6 }
  0x14   : > { %417 = vmatmul.msk.f32.vlgmr.msra.gmra.mxu0 %vm242_vm0, %v210_v7  ;;  %419 = vmatmul.msk.f32.vlgmr.msra.gmra.mxu2 %vm242_vm0, %v212_v8 }
  0x15   : > { %421 = vmatmul.msk.f32.vlgmr.msra.gmra.mxu1 %vm242_vm0, %v210_v7  ;;  %423 = vmatmul.msk.f32.vlgmr.msra.gmra.mxu3 %vm242_vm0, %v212_v8 }
  0x16   : > { %239 = vperm.xlu1 %459, %v217_v9   ;;  %229 = vperm.xlu0 %458, %v215_v10  }
  0x1c   : > { %418 = vmatmul.msk.f32.gmra.mxu0 %vm242_vm0, %v211_v11  ;;  %420 = vmatmul.msk.f32.gmra.mxu2 %vm242_vm0, %v213_v12 }
  0x1d   : > { %422 = vmatmul.msk.f32.gmra.mxu1 %vm242_vm0, %v211_v11  ;;  %424 = vmatmul.msk.f32.gmra.mxu3 %vm242_vm0, %v213_v12 }
  0x80   : > { %v225_v13 = vpop.permute.xlu0 %224  ;;  %v235_v18 = vpop.permute.xlu1 %234 }
  0x88   : > { %v230_v22 = vpop.permute.xlu0 %229  ;;  %v240_v28 = vpop.permute.xlu1 %239 }
  0x91   : > { %v272_v14 = vpop.f32.mrf.mxu0 }
  0x92   : > { %v273_v15 = vadd.f32 %v272_v14, %v225_v13  ;;  %v301_v16 = vpop.f32.mrf.mxu1 }
  0x93   : > { %v302_v17 = vadd.f32 %v301_v16, %v225_v13 }
  0x94   : > { %313 = vst [vmem:[%s208_s16] sm:$0xff] %v273_v15 }
  0x95   : > { %314 = vst [vmem:[%s208_s16 + $0x8] sm:$0xff] %v302_v17 }
  0x97   : > { %v278_v19 = vpop.f32.mrf.mxu2 }
  0x98   : > { %v279_v20 = vadd.f32 %v278_v19, %v235_v18  ;;  %v307_v21 = vpop.f32.mrf.mxu3 }
  0x99   : > { %v308_v23 = vadd.f32 %v307_v21, %v235_v18  ;;  %v275_v24 = vpop.f32.mrf.mxu0 }
  0x9a   : > { %317 = vst [vmem:[%s208_s16 + $0x20] sm:$0xff] %v279_v20  ;;  %v276_v25 = vadd.f32 %v275_v24, %v230_v22  ;;  %v304_v26 = vpop.f32.mrf.mxu1 }
  0x9b   : > { %318 = vst [vmem:[%s208_s16 + $0x28] sm:$0xff] %v308_v23  ;;  %v305_v27 = vadd.f32 %v304_v26, %v230_v22 }
  0x9c   : > { %315 = vst [vmem:[%s208_s16 + $0x10] sm:$0xff] %v276_v25 }
  0x9d   : > { %316 = vst [vmem:[%s208_s16 + $0x18] sm:$0xff] %v305_v27 }
  0x9f   : > { %v281_v29 = vpop.f32.mrf.mxu2 }
  0xa0   : > { %v282_v30 = vadd.f32 %v281_v29, %v240_v28  ;;  %v310_v31 = vpop.f32.mrf.mxu3 }
  0xa1   : > { %v311_v32 = vadd.f32 %v310_v31, %v240_v28 }
  0xa2   : > { %319 = vst [vmem:[%s208_s16 + $0x30] sm:$0xff] %v282_v30 }
  0xa3   : > { %320 = vst [vmem:[%s208_s16 + $0x38] sm:$0xff] %v311_v32 }
  0xa4 PF: > { %s13_s14 = sadd.s32 1, %s482_s14   ;;  %s578_s12 = smov %s478_s13 }
  0xa5   : > { %p10_p5 = scmp.ge.s32.totalorder %s13_s14, 4   ;;  %s579_s13 = smov %s581_s15 }
  0xa7   :  { %12 = sbr.rel (!%p10_p5) target bundleno = 2 (0x2), region = 62 }

</bundles_post_ra>
